<compile_context>
chip_gen: v7x
topology: tpu7x:2x2x1
jax: 0.10.0
libtpu: 0.0.40
codegen_flags: <defaults>
</compile_context>

<pallas_src>
import functools

import jax
import jax.numpy as jnp
from jax.experimental import pallas as pl
from jax.experimental.pallas import tpu as pltpu

LANE = 128      # vreg lane width
SUBLANE = 8     # vreg sublane width


def _round_up(v, m):
    return (v + m - 1) // m * m


def _fcn_fused_kernel(*refs, num_layers: int, use_activation: bool, compute_dtype):
    """refs = (x_ref, w0, b0, w1, b1, ..., o_ref).

    x: [TM, K0] batch tile, w_i: [K_i, N_i_pad] pre-transposed MXU-dtype
    (no in-kernel transpose), b_i: [1, N_i_pad] f32.  All intermediates live
    in vregs/VMEM; only the final activation is stored (lane-dense).
    """
    x_ref = refs[0]
    o_ref = refs[-1]
    h = x_ref[...].astype(compute_dtype)
    for i in range(num_layers):
        w = refs[1 + 2 * i][...]                                  # [K, N_pad]
        b = refs[2 + 2 * i][...]                                  # [1, N_pad] f32
        acc = jnp.dot(h, w, preferred_element_type=jnp.float32) + b   # f32 accum
        if use_activation and i < num_layers - 1:
            acc = jnp.maximum(acc, 0.0)
            # TODO(synk): only ReLU (and no-activation) supported; other
            # torch activation classes would need their own elementwise op here.
        h = acc.astype(compute_dtype) if i < num_layers - 1 else acc
    o_ref[...] = h.astype(o_ref.dtype)


def init_fcn_params(key, layer_sizes):
    """PyTorch-style nn.Linear default init: w,b ~ U(-1/sqrt(fan_in), +1/sqrt(fan_in)).
    Returns list of (w [N, K], b [N]) matching the torch module's layout."""
    params = []
    for i in range(len(layer_sizes) - 1):
        fan_in, fan_out = layer_sizes[i], layer_sizes[i + 1]
        key, kw, kb = jax.random.split(key, 3)
        bound = 1.0 / jnp.sqrt(fan_in)
        w = jax.random.uniform(kw, (fan_out, fan_in), jnp.float32, -bound, bound)
        b = jax.random.uniform(kb, (fan_out,), jnp.float32, -bound, bound)
        params.append((w, b))
    return params


def prepare_fcn_params(params, compute_dtype=jnp.bfloat16):
    """One-time prep: transpose weights to [K, N], pack to the MXU dtype, and
    zero-pad output lanes (N) to multiples of 128.  Layer-0's contraction dim
    is left unpadded; later layers' K is padded to the previous layer's N_pad
    so shapes chain exactly (zero rows contribute exactly zero)."""
    prepared, dims = [], []
    prev_n_pad = None
    for idx, (w, b) in enumerate(params):
        n, k = w.shape
        k_pad = k if idx == 0 else max(prev_n_pad, k)
        n_pad = _round_up(n, LANE)
        wt = jnp.zeros((k_pad, n_pad), compute_dtype).at[:k, :n].set(
            w.T.astype(compute_dtype))
        bp = jnp.zeros((1, n_pad), jnp.float32).at[0, :n].set(b.astype(jnp.float32))
        prepared.append((wt, bp))
        dims.append((k, n, k_pad, n_pad))
        prev_n_pad = n_pad
    return prepared, dims


def fcn_forward(x, prepared_params, dims, *, use_activation: bool, tile_m=None,
                compute_dtype=jnp.bfloat16):
    """Single fused pallas_call implementing FCN.forward, batch-tiled."""
    b_sz, k0 = x.shape
    num_layers = len(prepared_params)
    assert k0 == dims[0][0], "input feature dim mismatch"
    n_last, n_last_pad = dims[-1][1], dims[-1][3]

    # Batch tiling: tile is a multiple of 8; batch padded to a tile multiple.
    b_al = _round_up(b_sz, SUBLANE)
    tm = min(b_al, 256) if tile_m is None else _round_up(min(tile_m, b_al), SUBLANE)
    b_pad = _round_up(b_al, tm)
    grid_m = b_pad // tm

    x_pad = x if b_pad == b_sz else jnp.pad(x, ((0, b_pad - b_sz), (0, 0)))

    out_dtype = x.dtype
    itemsize = jnp.dtype(out_dtype).itemsize

    # Explicit VMEM budget: resident weights/biases (single-buffered) +
    # double-buffered x/out tiles + per-layer activation tiles, with headroom.
    weight_bytes = sum(wt.size * wt.dtype.itemsize + bp.size * bp.dtype.itemsize
                       for (wt, bp) in prepared_params)
    io_bytes = 2 * (tm * k0 * itemsize + tm * n_last_pad * itemsize)
    act_bytes = sum(2 * tm * np_ * 4 for (_, _, _, np_) in dims)
    vmem_limit = int(min(max(2 * (weight_bytes + io_bytes + act_bytes) + (4 << 20),
                             32 << 20), 64 << 20))

    flops = sum(2 * b_pad * kp * np_ for (_, _, kp, np_) in dims)
    bytes_accessed = int(x_pad.size * itemsize + weight_bytes
                         + b_pad * n_last_pad * itemsize)

    flat_params = []
    for (wt, bp) in prepared_params:
        flat_params.extend([wt, bp])

    def build_and_call(single_buffer_resident):
        def resident_spec(shape):
            if single_buffer_resident:
                # Block index never changes -> single buffer halves VMEM footprint.
                return pl.BlockSpec(shape, lambda i: (0, 0),
                                    pipeline_mode=pl.Buffered(1))
            return pl.BlockSpec(shape, lambda i: (0, 0))

        in_specs = [pl.BlockSpec((tm, k0), lambda i: (i, 0))]
        for (wt, bp) in prepared_params:
            in_specs.append(resident_spec(wt.shape))
            in_specs.append(resident_spec(bp.shape))

        return pl.pallas_call(
            functools.partial(_fcn_fused_kernel, num_layers=num_layers,
                              use_activation=use_activation,
                              compute_dtype=compute_dtype),
            out_shape=jax.ShapeDtypeStruct((b_pad, n_last_pad), out_dtype),
            grid=(grid_m,),
            in_specs=in_specs,
            out_specs=pl.BlockSpec((tm, n_last_pad), lambda i: (i, 0)),
            compiler_params=pltpu.CompilerParams(
                dimension_semantics=("parallel",),
                vmem_limit_bytes=vmem_limit),
            cost_estimate=pl.CostEstimate(flops=flops, transcendentals=0,
                                          bytes_accessed=bytes_accessed),
        )(x_pad, *flat_params)

    try:
        out = build_and_call(True)
    except Exception:
        # Older JAX without BlockSpec pipeline_mode support: default buffering.
        out = build_and_call(False)

    # Slice padded batch / lanes back to the logical output.
    return out[:b_sz, :n_last]


if __name__ == "__main__":
    # FCN(layer_sizes=[64, 128, 32], activation=nn.ReLU)
    layer_sizes = [64, 128, 32]
    batch = 40       # not a tile multiple -> exercises batch padding
    tile_m = 16      # -> grid of 3 batch tiles (pipelined / megacore-splittable)

    key = jax.random.PRNGKey(0)
    key, kx = jax.random.split(key)
    x = jax.random.normal(kx, (batch, layer_sizes[0]), jnp.float32)
    params = init_fcn_params(key, layer_sizes)       # PyTorch-style (w[N,K], b[N])
    prepared, dims = prepare_fcn_params(params)      # one-time bf16 / lane-dense prep

    # With ReLU between layers (activation=nn.ReLU).
    out = fcn_forward(x, prepared, dims, use_activation=True, tile_m=tile_m)
    out = jax.block_until_ready(out)

    ref = x
    for i, (w, b) in enumerate(params):
        ref = ref @ w.T + b
        if i < len(params) - 1:
            ref = jnp.maximum(ref, 0.0)
    assert out.shape == (batch, layer_sizes[-1])
    # bf16 matmul operands (f32 accumulation) -> relaxed tolerance vs. pure f32.
    assert jnp.allclose(out, ref, atol=3e-2, rtol=3e-2), float(jnp.max(jnp.abs(out - ref)))

    # activation=None path (pure stack of Linear layers).
    out2 = fcn_forward(x, prepared, dims, use_activation=False, tile_m=tile_m)
    out2 = jax.block_until_ready(out2)
    ref2 = x
    for (w, b) in params:
        ref2 = ref2 @ w.T + b
    assert jnp.allclose(out2, ref2, atol=3e-2, rtol=3e-2)

    print("KERNEL_OK")
</pallas_src>

<mosaic_0001>
module attributes {stable_mosaic.version = 11 : i64} {
  func.func @_fcn_fused_kernel(%arg0: i32, %arg1: memref<16x64xf32, #tpu.memory_space<vmem>>, %arg2: memref<64x128xbf16, #tpu.memory_space<vmem>>, %arg3: memref<1x128xf32, #tpu.memory_space<vmem>>, %arg4: memref<128x128xbf16, #tpu.memory_space<vmem>>, %arg5: memref<1x128xf32, #tpu.memory_space<vmem>>, %arg6: memref<16x128xf32, #tpu.memory_space<vmem>>) attributes {dimension_semantics = [#tpu.dimension_semantics<parallel>], iteration_bounds = array<i64: 3>, scalar_prefetch = 0 : i64, scratch_operands = 0 : i64, tpu.core_type = #tpu.core_type<tc>, window_params = [{transform_indices = @transform_0, window_bounds = array<i64: 16, 64>}, {pipeline_mode = #tpu.pipeline_mode<synchronous>, transform_indices = @transform_1, window_bounds = array<i64: 64, 128>}, {pipeline_mode = #tpu.pipeline_mode<synchronous>, transform_indices = @transform_2, window_bounds = array<i64: 1, 128>}, {pipeline_mode = #tpu.pipeline_mode<synchronous>, transform_indices = @transform_3, window_bounds = array<i64: 128, 128>}, {pipeline_mode = #tpu.pipeline_mode<synchronous>, transform_indices = @transform_4, window_bounds = array<i64: 1, 128>}, {transform_indices = @transform_5, window_bounds = array<i64: 16, 128>}]} {
    %c0 = arith.constant 0 : index
    %c0_0 = arith.constant 0 : index
    %0 = vector.load %arg1[%c0, %c0_0] : memref<16x64xf32, #tpu.memory_space<vmem>>, vector<16x64xf32>
    %1 = arith.truncf %0 : vector<16x64xf32> to vector<16x64xbf16>
    %c0_1 = arith.constant 0 : index
    %c0_2 = arith.constant 0 : index
    %2 = vector.load %arg2[%c0_1, %c0_2] : memref<64x128xbf16, #tpu.memory_space<vmem>>, vector<64x128xbf16>
    %c0_3 = arith.constant 0 : index
    %c0_4 = arith.constant 0 : index
    %3 = vector.load %arg3[%c0_3, %c0_4] : memref<1x128xf32, #tpu.memory_space<vmem>>, vector<1x128xf32>
    %cst = arith.constant dense<0.000000e+00> : vector<16x128xf32>
    %4 = tpu.matmul %1, %2, %cst {dimension_numbers = #tpu.dot_dimension_numbers<[1], [0], [0], [1], [0, 0, 1, 1], [], []>} : vector<16x64xbf16>, vector<64x128xbf16>, vector<16x128xf32> -> vector<16x128xf32>
    %5 = vector.broadcast %3 : vector<1x128xf32> to vector<16x128xf32>
    %6 = arith.addf %4, %5 : vector<16x128xf32>
    %cst_5 = arith.constant 0.000000e+00 : f32
    %7 = vector.broadcast %cst_5 : f32 to vector<16x128xf32>
    %8 = arith.maximumf %6, %7 : vector<16x128xf32>
    %9 = arith.truncf %8 : vector<16x128xf32> to vector<16x128xbf16>
    %c0_6 = arith.constant 0 : index
    %c0_7 = arith.constant 0 : index
    %10 = vector.load %arg4[%c0_6, %c0_7] : memref<128x128xbf16, #tpu.memory_space<vmem>>, vector<128x128xbf16>
    %c0_8 = arith.constant 0 : index
    %c0_9 = arith.constant 0 : index
    %11 = vector.load %arg5[%c0_8, %c0_9] : memref<1x128xf32, #tpu.memory_space<vmem>>, vector<1x128xf32>
    %cst_10 = arith.constant dense<0.000000e+00> : vector<16x128xf32>
    %12 = tpu.matmul %9, %10, %cst_10 {dimension_numbers = #tpu.dot_dimension_numbers<[1], [0], [0], [1], [0, 0, 1, 1], [], []>} : vector<16x128xbf16>, vector<128x128xbf16>, vector<16x128xf32> -> vector<16x128xf32>
    %13 = vector.broadcast %11 : vector<1x128xf32> to vector<16x128xf32>
    %14 = arith.addf %12, %13 : vector<16x128xf32>
    %c0_11 = arith.constant 0 : index
    %c0_12 = arith.constant 0 : index
    %15 = vector.load %arg6[%c0_11, %c0_12] : memref<16x128xf32, #tpu.memory_space<vmem>>, vector<16x128xf32>
    tpu.vector_store %arg6[%c0_11, %c0_12], %14 {strides = array<i32>} : memref<16x128xf32, #tpu.memory_space<vmem>>, vector<16x128xf32>,
    return
  }
  func.func @transform_0(%arg0: i32) -> (i32, i32) {
    %c0_i32 = arith.constant 0 : i32
    %c0_i32_0 = arith.constant 0 : i32
    return %arg0, %c0_i32 : i32, i32
  }
  func.func @transform_1(%arg0: i32) -> (i32, i32) {
    %c0_i32 = arith.constant 0 : i32
    %c0_i32_0 = arith.constant 0 : i32
    %c0_i32_1 = arith.constant 0 : i32
    return %c0_i32, %c0_i32_0 : i32, i32
  }
  func.func @transform_2(%arg0: i32) -> (i32, i32) {
    %c0_i32 = arith.constant 0 : i32
    %c0_i32_0 = arith.constant 0 : i32
    %c0_i32_1 = arith.constant 0 : i32
    return %c0_i32, %c0_i32_0 : i32, i32
  }
  func.func @transform_3(%arg0: i32) -> (i32, i32) {
    %c0_i32 = arith.constant 0 : i32
    %c0_i32_0 = arith.constant 0 : i32
    %c0_i32_1 = arith.constant 0 : i32
    return %c0_i32, %c0_i32_0 : i32, i32
  }
  func.func @transform_4(%arg0: i32) -> (i32, i32) {
    %c0_i32 = arith.constant 0 : i32
    %c0_i32_0 = arith.constant 0 : i32
    %c0_i32_1 = arith.constant 0 : i32
    return %c0_i32, %c0_i32_0 : i32, i32
  }
  func.func @transform_5(%arg0: i32) -> (i32, i32) {
    %c0_i32 = arith.constant 0 : i32
    %c0_i32_0 = arith.constant 0 : i32
    return %arg0, %c0_i32 : i32, i32
  }
}

module attributes {stable_mosaic.version = 11 : i64} {
  func.func @_fcn_fused_kernel(%arg0: i32, %arg1: memref<16x64xf32, #tpu.memory_space<vmem>>, %arg2: memref<64x128xbf16, #tpu.memory_space<vmem>>, %arg3: memref<1x128xf32, #tpu.memory_space<vmem>>, %arg4: memref<128x128xbf16, #tpu.memory_space<vmem>>, %arg5: memref<1x128xf32, #tpu.memory_space<vmem>>, %arg6: memref<16x128xf32, #tpu.memory_space<vmem>>) attributes {dimension_semantics = [#tpu.dimension_semantics<parallel>], iteration_bounds = array<i64: 3>, scalar_prefetch = 0 : i64, scratch_operands = 0 : i64, tpu.core_type = #tpu.core_type<tc>, window_params = [{transform_indices = @transform_0, window_bounds = array<i64: 16, 64>}, {pipeline_mode = #tpu.pipeline_mode<synchronous>, transform_indices = @transform_1, window_bounds = array<i64: 64, 128>}, {pipeline_mode = #tpu.pipeline_mode<synchronous>, transform_indices = @transform_2, window_bounds = array<i64: 1, 128>}, {pipeline_mode = #tpu.pipeline_mode<synchronous>, transform_indices = @transform_3, window_bounds = array<i64: 128, 128>}, {pipeline_mode = #tpu.pipeline_mode<synchronous>, transform_indices = @transform_4, window_bounds = array<i64: 1, 128>}, {transform_indices = @transform_5, window_bounds = array<i64: 16, 128>}]} {
    %c0 = arith.constant 0 : index
    %c0_0 = arith.constant 0 : index
    %0 = vector.load %arg1[%c0, %c0_0] : memref<16x64xf32, #tpu.memory_space<vmem>>, vector<16x64xf32>
    %1 = arith.truncf %0 : vector<16x64xf32> to vector<16x64xbf16>
    %c0_1 = arith.constant 0 : index
    %c0_2 = arith.constant 0 : index
    %2 = vector.load %arg2[%c0_1, %c0_2] : memref<64x128xbf16, #tpu.memory_space<vmem>>, vector<64x128xbf16>
    %c0_3 = arith.constant 0 : index
    %c0_4 = arith.constant 0 : index
    %3 = vector.load %arg3[%c0_3, %c0_4] : memref<1x128xf32, #tpu.memory_space<vmem>>, vector<1x128xf32>
    %cst = arith.constant dense<0.000000e+00> : vector<16x128xf32>
    %4 = tpu.matmul %1, %2, %cst {dimension_numbers = #tpu.dot_dimension_numbers<[1], [0], [0], [1], [0, 0, 1, 1], [], []>} : vector<16x64xbf16>, vector<64x128xbf16>, vector<16x128xf32> -> vector<16x128xf32>
    %5 = vector.broadcast %3 : vector<1x128xf32> to vector<16x128xf32>
    %6 = arith.addf %4, %5 : vector<16x128xf32>
    %cst_5 = arith.constant 0.000000e+00 : f32
    %7 = vector.broadcast %cst_5 : f32 to vector<16x128xf32>
    %8 = arith.maximumf %6, %7 : vector<16x128xf32>
    %9 = arith.truncf %8 : vector<16x128xf32> to vector<16x128xbf16>
    %c0_6 = arith.constant 0 : index
    %c0_7 = arith.constant 0 : index
    %10 = vector.load %arg4[%c0_6, %c0_7] : memref<128x128xbf16, #tpu.memory_space<vmem>>, vector<128x128xbf16>
    %c0_8 = arith.constant 0 : index
    %c0_9 = arith.constant 0 : index
    %11 = vector.load %arg5[%c0_8, %c0_9] : memref<1x128xf32, #tpu.memory_space<vmem>>, vector<1x128xf32>
    %cst_10 = arith.constant dense<0.000000e+00> : vector<16x128xf32>
    %12 = tpu.matmul %9, %10, %cst_10 {dimension_numbers = #tpu.dot_dimension_numbers<[1], [0], [0], [1], [0, 0, 1, 1], [], []>} : vector<16x128xbf16>, vector<128x128xbf16>, vector<16x128xf32> -> vector<16x128xf32>
    %13 = vector.broadcast %11 : vector<1x128xf32> to vector<16x128xf32>
    %14 = arith.addf %12, %13 : vector<16x128xf32>
    %c0_11 = arith.constant 0 : index
    %c0_12 = arith.constant 0 : index
    %15 = vector.load %arg6[%c0_11, %c0_12] : memref<16x128xf32, #tpu.memory_space<vmem>>, vector<16x128xf32>
    tpu.vector_store %arg6[%c0_11, %c0_12], %14 {strides = array<i32>} : memref<16x128xf32, #tpu.memory_space<vmem>>, vector<16x128xf32>,
    return
  }
  func.func @transform_0(%arg0: i32) -> (i32, i32) {
    %c0_i32 = arith.constant 0 : i32
    %c0_i32_0 = arith.constant 0 : i32
    return %arg0, %c0_i32 : i32, i32
  }
  func.func @transform_1(%arg0: i32) -> (i32, i32) {
    %c0_i32 = arith.constant 0 : i32
    %c0_i32_0 = arith.constant 0 : i32
    %c0_i32_1 = arith.constant 0 : i32
    return %c0_i32, %c0_i32_0 : i32, i32
  }
  func.func @transform_2(%arg0: i32) -> (i32, i32) {
    %c0_i32 = arith.constant 0 : i32
    %c0_i32_0 = arith.constant 0 : i32
    %c0_i32_1 = arith.constant 0 : i32
    return %c0_i32, %c0_i32_0 : i32, i32
  }
  func.func @transform_3(%arg0: i32) -> (i32, i32) {
    %c0_i32 = arith.constant 0 : i32
    %c0_i32_0 = arith.constant 0 : i32
    %c0_i32_1 = arith.constant 0 : i32
    return %c0_i32, %c0_i32_0 : i32, i32
  }
  func.func @transform_4(%arg0: i32) -> (i32, i32) {
    %c0_i32 = arith.constant 0 : i32
    %c0_i32_0 = arith.constant 0 : i32
    %c0_i32_1 = arith.constant 0 : i32
    return %c0_i32, %c0_i32_0 : i32, i32
  }
  func.func @transform_5(%arg0: i32) -> (i32, i32) {
    %c0_i32 = arith.constant 0 : i32
    %c0_i32_0 = arith.constant 0 : i32
    return %arg0, %c0_i32 : i32, i32
  }
}

</mosaic_0001>

<bundles_post_ra>
// kernel: tpu_custom_call.1
= control target key start
LH: loop header
LB: loop body
LE: loop exit
PB: predicated region body
PF: predicated region fallthrough
CT: control target
= control target key end

     0   :  { %10 = vsyncpa [#allocation3], 0  ;;  %s1188_s0 = inlined_call_operand.hbm [shape: f32[48,64], index: 0, kind: input, shape index: {}]   ;;  %s1189_s1 = inlined_call_operand.hbm [shape: bf16[64,128], index: 1, kind: input, shape index: {}]   ;;  %s1190_s2 = inlined_call_operand.vmem [shape: f32[1,128], index: 2, kind: input, shape index: {}]   ;;  %s1191_s3 = inlined_call_operand.hbm [shape: bf16[128,128], index: 3, kind: input, shape index: {}]   ;;  %s1192_s4 = inlined_call_operand.vmem [shape: f32[1,128], index: 4, kind: input, shape index: {}]   ;;  %s1193_s5 = inlined_call_operand.hbm [shape: f32[48,128], index: 5, kind: output, shape index: {}]  }
   0x1   :  { %12 = vsyncpa [#allocation3 + $0x1], 0 }
   0x2   :  { %13 = vsyncpa [#allocation6], 0 }
   0x3   :  { %14 = vsyncpa [#allocation4], 0 }
   0x4   :  { %16 = vsyncpa [#allocation4 + $0x1], 0  ;;  %s953_s18 = smov 0   ;;  %s955_s19 = smov 0  }
   0x5   :  { %s957_s20 = smov 0   ;;  %s959_s21 = smov 0  }
   0x6 LB: > { %s974_s22 = sadd.s32 4294967295, %s909_s21   ;;  %s585_s23 = sadd.s32 4294967294, %s909_s21   ;;  %s909_s21 = sphi %s959_s21, %s1212_s21   ;;  %s905_s20 = sphi %s957_s20, %s1211_s20   ;;  %s901_s19 = sphi %s955_s19, %s1210_s19   ;;  %s897_s18 = sphi %s953_s18, %s1209_s18  }
   0x7   : > { %p42_p0 = scmp.ne.s32.totalorder %s901_s19, %s897_s18  ;;  %p1194_p1 = scmp.eq.s32.totalorder %s974_s22, 0 }
   0x8   : > { %p156_p3 = scmp.eq.s32.totalorder %s585_s23, 2  ;;  %p586_p5 = scmp.ge.s32.totalorder %s909_s21, 1 }
   0x9   : > { %p983_p4 = por %p1194_p1, %p42_p0  ;;  %p163_p7 = scmp.lt.s32.totalorder %s909_s21, 4 }
   0xa   : > { %p988_p6 = por %p156_p3, %p42_p0  ;;  %s911_s27 = smov [#allocation5]  }
   0xb   : > { %s1197_s24 = scalar_select %p983_p4, 1, 0 }
   0xc   : > { %s1198_s25 = scalar_select %p988_p6, 1, 0 }
   0xd   : > { %p993_p8 = pnand %p586_p5, %p163_p7  ;;  %s175_s28 = sshll.u32 %s911_s27, 4  ;;  %s176_s28 = int_to_ptr.vmem [resolvable:$true] %s175_s28 }
   0xe   : > { %s912_s30 = smov [#allocation7]   ;;  %s753_s9 = scalar_lea.hbm %s1189_s1, 512 }
   0xf   : > { %s1199_s26 = scalar_select %p993_p8, 1, 0 }
  0x10   : > { %p678_p9 = pneg %p993_p8  ;;  %s191_s6 = sshll.u32 %s912_s30, 4  ;;  %s1005_s6 = int_to_ptr.vmem [resolvable:$true] %s191_s6 }
  0x11   : > { %p754_p11 = scmp.ne.s32.totalorder %s1189_s1, %s753_s9  ;;  %p760_p3 = scmp.lt.u32.totalorder %s753_s9, %s1189_s1 }
  0x12   : > { %p1001_p10 = pnand %p678_p9, %p1194_p1 }
  0x14   : > { %p755_p12 = pneg %p1001_p10 }
  0x16   : > { %p756_p13 = pnand %p755_p12, %p754_p11 }
  0x18   : > { %p757_p0 = pneg %p756_p13 }
  0x1a   : > { %p762_p5 = pnand %p760_p3, %p757_p0 }
  0x1c   : > { %765 = shalt.err (!%p762_p5)
}
  0x1d   : > { %s766_s14 = scalar_lea.vmem %s176_s28, 512  ;;  %p774_p2 = scmp.lt.s32.totalorder %s176_s28, %s176_s28 }
  0x1e   : > { %p767_p7 = scmp.ne.s32.totalorder %s176_s28, %s766_s14  ;;  %p775_p6 = scmp.lt.s32.totalorder %s766_s14, %s766_s14 }
  0x20   : > { %p769_p9 = pnand %p767_p7, %p755_p12  ;;  %p776_p4 = por %p775_p6, %p774_p2 }
  0x22   : > { %p770_p1 = pneg %p769_p9 }
  0x24   : > { %p777_p8 = pnand %p776_p4, %p770_p1 }
  0x26   : > { %780 = shalt.err (!%p777_p8)
}
  0x27   : > { %s913_s15 = smov 64   ;;  %s914_s16 = smov 4  }
  0x28   : > { %681 = dma.hbm_to_vmem [thread:$0]  (!%p1001_p10), %s1189_s1, 512, %s176_s28, [#allocation6], %s913_s15, %s913_s15, %s914_s16  }
  0x29   : > { %s781_s7 = scalar_lea.hbm %s1191_s3, 1024 }
  0x2a   : > { %p782_p11 = scmp.ne.s32.totalorder %s1191_s3, %s781_s7  ;;  %p788_p4 = scmp.lt.u32.totalorder %s781_s7, %s1191_s3 }
  0x2c   : > { %p784_p1 = pnand %p782_p11, %p755_p12 }
  0x2e   : > { %p785_p2 = pneg %p784_p1 }
  0x30   : > { %p790_p6 = pnand %p788_p4, %p785_p2 }
  0x32   : > { %793 = shalt.err (!%p790_p6)
}
  0x33   : > { %s794_s28 = scalar_lea.vmem %s1005_s6, 1024  ;;  %p802_p3 = scmp.lt.s32.totalorder %s1005_s6, %s1005_s6 }
  0x34   : > { %p795_p8 = scmp.ne.s32.totalorder %s1005_s6, %s794_s28  ;;  %p803_p5 = scmp.lt.s32.totalorder %s794_s28, %s794_s28 }
  0x36   : > { %p797_p13 = pnand %p795_p8, %p755_p12  ;;  %p804_p7 = por %p803_p5, %p802_p3 }
  0x38   : > { %p798_p0 = pneg %p797_p13 }
  0x3a   : > { %p805_p9 = pnand %p804_p7, %p798_p0 }
  0x3c   : > { %808 = shalt.err (!%p805_p9)
}
  0x3d   : > { %684 = dma.hbm_to_vmem [thread:$0]  (!%p1001_p10), %s1191_s3, 1024, %s1005_s6, [#allocation6], %s913_s15, %s913_s15, %s914_s16  }
  0x3e   : > { %s1055_s14 = sadd.s32 1, %s909_s21   ;;  %s29_s29 = sadd.s32 1, %s905_s20 }
  0x3f   : > { %s26_s17 = ssub.s32 %s909_s21, %s1055_s14  ;;  %p36_p12 = scmp.ne.s32.totalorder %s905_s20, %s901_s19 }
  0x40   : > { %p27_p11 = scmp.eq.s32.totalorder %s26_s17, 0  ;;  %p37_p1 = scmp.eq.s32.totalorder %s909_s21, 0 }
  0x41   : > { %p1201_p2 = scmp.eq.s32.totalorder %s974_s22, 2  ;;  %p695_p6 = scmp.lt.s32.totalorder %s909_s21, 3 }
  0x42   : > { %s1071_s27 = scalar_select %p27_p11, %s905_s20, %s29_s29  }
  0x43   : > { %p1065_p4 = por %p1201_p2, %p36_p12  ;;  %p38_p8 = por %p37_p1, %p36_p12 }
  0x44   : > { %s208_s30 = sand.u32 1, %s905_s20   ;;  %s618_s6 = sshll.u32 %s909_s21, 8 }
  0x45   : > { %s590_s7 = sshll.u32 %s208_s30, 4  ;;  %s1078_s8 = scalar_lea.hbm %s1188_s0, %s618_s6 }
  0x46   : > { %s212_s9 = scalar_lea.vmem [#allocation2], %s590_s7  ;;  %p1082_p10 = pnand %p695_p6, %p38_p8 }
  0x47   : > { %s219_s10 = sshll.u32 %s212_s9, 4  ;;  %s1086_s28 = scalar_lea.sflag [#allocation3], %s208_s30  ;;  %s1080_s10 = int_to_ptr.vmem [resolvable:$true] %s219_s10 }
  0x48   : > { %s809_s12 = scalar_lea.hbm %s1078_s8, 256  ;;  %p811_p0 = pneg %p1082_p10 }
  0x49   : > { %p810_p13 = scmp.ne.s32.totalorder %s1078_s8, %s809_s12  ;;  %s814_s17 = scalar_lea.hbm %s1188_s0, 768 }
  0x4a   : > { %p815_p7 = scmp.lt.u32.totalorder %s1078_s8, %s1188_s0  ;;  %p816_p9 = scmp.lt.u32.totalorder %s814_s17, %s809_s12 }
  0x4b   : > { %p812_p3 = pnand %p811_p0, %p810_p13  ;;  %p818_p11 = scmp.lt.u32.totalorder %s809_s12, %s1078_s8 }
  0x4c   : > { %p817_p12 = por %p816_p9, %p815_p7 }
  0x4d   : > { %p813_p5 = pneg %p812_p3 }
  0x4e   : > { %p819_p1 = por %p818_p11, %p817_p12 }
  0x50   : > { %p820_p2 = pnand %p819_p1, %p813_p5 }
  0x52   : > { %823 = shalt.err (!%p820_p2)
}
  0x53   : > { %s824_s30 = scalar_lea.vmem %s1080_s10, 256  ;;  %s915_s15 = smov [#allocation2]  }
  0x54   : > { %p825_p6 = scmp.ne.s32.totalorder %s1080_s10, %s824_s30  ;;  %s829_s16 = sshll.u32 %s915_s15, 4  ;;  %s830_s16 = int_to_ptr.vmem [resolvable:$false] %s829_s16 }
  0x55   : > { %s831_s9 = scalar_lea.vmem %s830_s16, 512  ;;  %p832_p3 = scmp.lt.s32.totalorder %s1080_s10, %s830_s16 }
  0x56   : > { %p827_p8 = pnand %p825_p6, %p811_p0  ;;  %p833_p7 = scmp.lt.s32.totalorder %s831_s9, %s824_s30 }
  0x58   : > { %p828_p13 = pneg %p827_p8  ;;  %p834_p9 = por %p833_p7, %p832_p3 }
  0x5a   : > { %p835_p12 = pnand %p834_p9, %p828_p13 }
  0x5c   : > { %838 = shalt.err (!%p835_p12)
}
  0x5d   : > { %s916_s12 = smov 128   ;;  %s917_s13 = smov 8  }
  0x5e   : > { %688 = dma.hbm_to_vmem [thread:$0]  (!%p1082_p10), %s1078_s8, 256, %s1080_s10, %s1086_s28, %s916_s12, %s916_s12, %s917_s13  }
  0x5f   : > { %p1204_p0 = scmp.ne.s32.totalorder %s1199_s26, 0 }
  0x60   : > { %s1117_s29 = sand.u32 (!%p1204_p0), 1, %s901_s19   ;;  %p1205_p5 = scmp.ne.s32.totalorder (!%p1204_p0), %s1197_s24, 0 }
  0x61   : > { %231 = sbr.rel (%p1204_p0) target bundleno = 577 (0x241), region = 40  ;;  %s594_s17 = sshll.u32 (!%p1204_p0), %s1117_s29, 4 }
  0x62   : > { %s234_s7 = scalar_lea.sflag (!%p1204_p0), [#allocation3], %s1117_s29  ;;  %s237_s6 = scalar_lea.vmem (!%p1204_p0), [#allocation2], %s594_s17 }
  0x68   : > { %884 = dma.done.wait (%p1205_p5), %s234_s7, 256  }
  0x69   : > { %886 = vsyncadd (%p1205_p5), %s234_s7, 4294967040  ;;  %p1206_p10 = scmp.eq.s32.totalorder %s974_s22, 0 }
  0x6b   : > { %888 = dma.done.wait (%p1206_p10), [#allocation6], 1536   ;;  %p1207_p11 = pmov %p1206_p10 }
  0x6c   : > { %v918_v0 = vmov 0.0   ;;  %vm919_vm0 = vmmov 0   ;;  %v741_v1 = vld [vmem:[#allocation5] sm:$0xff]   ;;  %v742_v2 = vld [vmem:[#allocation5 + $0x8] sm:$0xff]   ;;  %v743_v4 = vld [vmem:[#allocation5 + $0x10] sm:$0xff]   ;;  %vm317_vm1 = vcmask 523264  }
  0x6d   : > { %890 = vsyncadd (%p1207_p11), [#allocation6], 4294965760  ;;  %634 = vmatprep.subr.bf16.mxu0 %v918_v0  ;;  %642 = vmatprep.mubr.msk.bf16.mxu0 %vm919_vm0, %v918_v0  ;;  %v745_v3 = vld [vmem:[#allocation7] sm:$0xff]   ;;  %v746_v5 = vld [vmem:[#allocation7 + $0x8] sm:$0xff]   ;;  %s271_s11 = scalar_lea.vmem [#allocation8], %s594_s17  ;;  %s619_s30 = sshll.u32 %s974_s22, 8 }
  0x6e   : > { %646 = vmatprep.subr.bf16.mxu1 %v918_v0  ;;  %662 = vmatprep.mubr.msk.bf16.mxu1 %vm919_vm0, %v918_v0  ;;  %v744_v6 = vld [vmem:[#allocation5 + $0x18] sm:$0xff]   ;;  %v275_v7 = vld [vmem:[%s237_s6] sm:$0xff]  ;;  %v750_v13 = vld [vmem:[#allocation7 + $0x28] sm:$0xff]   ;;  %s493_s28 = sshll.u32 %s271_s11, 4  ;;  %s1145_s9 = scalar_lea.hbm %s1193_s5, %s619_s30  ;;  %s1140_s28 = int_to_ptr.vmem [resolvable:$true] %s493_s28 }
  0x6f   : > { %635 = vmatpush3.bf16.msra.mxu0 %v741_v1  ;;  %647 = vmatpush3.bf16.msra.mxu1 %v745_v3  ;;  %v276_v8 = vld [vmem:[%s237_s6 + $0x8] sm:$0xff]  ;;  %v747_v9 = vld [vmem:[#allocation7 + $0x10] sm:$0xff]   ;;  %v749_v12 = vld [vmem:[#allocation7 + $0x20] sm:$0xff]   ;;  %s480_s12 = scalar_lea.sflag [#allocation4], %s1117_s29  ;;  %s839_s22 = scalar_lea.vmem %s1140_s28, 256 }
  0x70   : > { %636 = vmatprep.subr.bf16.mxu0 %v918_v0  ;;  %648 = vmatprep.subr.bf16.mxu1 %v918_v0  ;;  %v277_v10 = vpack.c.bf16 %v276_v8, %v275_v7  ;;  %v748_v11 = vld [vmem:[#allocation7 + $0x18] sm:$0xff]   ;;  %v751_v14 = vld [vmem:[#allocation7 + $0x30] sm:$0xff]   ;;  %v598_v16 = vld [vmem:[%s1190_s2] ss:$0 sm:$0xff]  ;;  %p840_p1 = scmp.ne.s32.totalorder %s1140_s28, %s839_s22  ;;  %s920_s13 = smov [#allocation8]  }
  0x71   : > { %v752_v15 = vld [vmem:[#allocation7 + $0x38] sm:$0xff]   ;;  %v604_v26 = vld [vmem:[%s1192_s4] ss:$0 sm:$0xff]  ;;  %s843_s17 = sshll.u32 %s920_s13, 4  ;;  %s844_s17 = int_to_ptr.vmem [resolvable:$false] %s843_s17 }
  0x72   : > { %p841_p2 = pnand %p840_p1, %p1065_p4  ;;  %s845_s7 = scalar_lea.vmem %s844_s17, 512 }
  0x73   : > { %637 = vmatpush3.bf16.msra.mxu0 %v742_v2  ;;  %649 = vmatpush3.bf16.msra.mxu1 %v746_v5  ;;  %p846_p8 = scmp.lt.s32.totalorder %s1140_s28, %s844_s17  ;;  %p847_p13 = scmp.lt.s32.totalorder %s845_s7, %s839_s22 }
  0x74   : > { %638 = vmatprep.subr.bf16.mxu0 %v918_v0  ;;  %650 = vmatprep.subr.bf16.mxu1 %v918_v0  ;;  %p842_p6 = pneg %p841_p2 }
  0x75   : > { %p848_p3 = por %p847_p13, %p846_p8 }
  0x77   : > { %639 = vmatpush3.bf16.msra.mxu0 %v743_v4  ;;  %651 = vmatpush3.bf16.msra.mxu1 %v747_v9  ;;  %p849_p7 = pnand %p848_p3, %p842_p6 }
  0x78   : > { %640 = vmatprep.subr.bf16.mxu0 %v918_v0  ;;  %652 = vmatprep.subr.bf16.mxu1 %v918_v0 }
  0x7b   : > { %641 = vmatpush3.bf16.msra.mxu0 %v744_v6  ;;  %653 = vmatpush3.bf16.msra.mxu1 %v748_v11 }
  0x7c   : > { %654 = vmatprep.subr.bf16.mxu1 %v918_v0 }
  0x7e   : > { %643 = vmatmul.mubr.msk.bf16.vlgmr.msra.gmra.mrb[0].mxu0 %vm317_vm1, %v277_v10 }
  0x7f   : > { %655 = vmatpush3.bf16.msra.mxu1 %v749_v12 }
  0x80   : > { %656 = vmatprep.subr.bf16.mxu1 %v918_v0 }
  0x83   : > { %657 = vmatpush3.bf16.msra.mxu1 %v750_v13 }
  0x84   : > { %658 = vmatprep.subr.bf16.mxu1 %v918_v0 }
  0x87   : > { %659 = vmatpush3.bf16.msra.mxu1 %v751_v14 }
  0x88   : > { %660 = vmatprep.subr.bf16.mxu1 %v918_v0 }
  0x8b   : > { %661 = vmatpush3.bf16.msra.mxu1 %v752_v15 }
 0x151   : > { %v355_v17 = vpop.f32.mrb[0].mxu0 }
 0x152   : > { %v356_v18 = vadd.f32 %v598_v16, %v355_v17  ;;  %v644_v19 = vpop.f32.mrb[1].mxu0 }
 0x153   : > { %v358_v20 = vpop.f32.mrb[2].mxu0 }
 0x154   : > { %v359_v21 = vadd.f32 %v598_v16, %v358_v20  ;;  %v645_v22 = vpop.f32.mrb[3].mxu0  ;;  %v362_v23 = vmax.f32 %v356_v18, 0.0 }
 0x156   : > { %v363_v24 = vmax.f32 %v359_v21, 0.0 }
 0x158   : > { %v364_v25 = vpack.c.bf16 %v363_v24, %v362_v23 }
 0x15a   : > { %663 = vmatmul.mubr.bf16.vlgmr.msra.gmra.mrb[0].mxu1 %v364_v25 }
 0x22d   : > { %v470_v27 = vpop.f32.mrb[0].mxu1 }
 0x22e   : > { %v471_v28 = vadd.f32 %v604_v26, %v470_v27  ;;  %v664_v29 = vpop.f32.mrb[1].mxu1 }
 0x22f   : > { %v473_v30 = vpop.f32.mrb[2].mxu1 }
 0x230   : > { %477 = vst [vmem:[%s271_s11] sm:$0xff] %v471_v28  ;;  %v474_v31 = vadd.f32 %v604_v26, %v473_v30  ;;  %v665_v32 = vpop.f32.mrb[3].mxu1 }
 0x232   : > { %478 = vst [vmem:[%s271_s11 + $0x8] sm:$0xff] %v474_v31 }
 0x233   : > { %852 = shalt.err (!%p849_p7)
}
 0x234   : > { %s853_s6 = scalar_lea.hbm %s1145_s9, 256  ;;  %s857_s8 = scalar_lea.hbm %s1193_s5, 768 }
 0x235   : > { %p854_p9 = scmp.ne.s32.totalorder %s1145_s9, %s853_s6  ;;  %p858_p5 = scmp.lt.u32.totalorder %s1145_s9, %s1193_s5 }
 0x236   : > { %p859_p10 = scmp.lt.u32.totalorder %s857_s8, %s853_s6  ;;  %p861_p1 = scmp.lt.u32.totalorder %s853_s6, %s1145_s9 }
 0x237   : > { %p855_p12 = pnand %p854_p9, %p1065_p4 }
 0x238   : > { %p860_p11 = por %p859_p10, %p858_p5 }
 0x239   : > { %p856_p0 = pneg %p855_p12 }
 0x23a   : > { %p862_p2 = por %p861_p1, %p860_p11 }
 0x23c   : > { %p863_p6 = pnand %p862_p2, %p856_p0 }
 0x23e   : > { %866 = shalt.err (!%p863_p6)
}
 0x23f   : > { %s921_s30 = smov 128   ;;  %s922_s15 = smov 8  }
 0x240   : > { %676 = dma.vmem_to_hbm [thread:$0]  (%p1065_p4), %s1140_s28, 256, %s1145_s9, %s480_s12, %s921_s30, %s921_s30, %s922_s15  }
 0x241 PF: > { %p698_p8 = scmp.ge.s32.totalorder %s909_s21, 2  ;;  %s508_s16 = sand.u32 1, %s897_s18  }
 0x242   : > { %p1208_p13 = scmp.ne.s32.totalorder %s1198_s25, 0  ;;  %s509_s22 = scalar_lea.sflag [#allocation4], %s508_s16 }
 0x244   : > { %p690_p3 = pnand %p698_p8, %p1208_p13 }
 0x246   : > { %892 = dma.done.wait (!%p690_p3), %s509_s22, 256  }
 0x247   : > { %894 = vsyncadd (!%p690_p3), %s509_s22, 4294967040  ;;  %p19_p7 = scmp.ge.s32.totalorder %s1055_s14, 5   ;;  %s1209_s18 = smov %s901_s19 }
 0x248   : > { %s1210_s19 = smov %s905_s20  ;;  %s1211_s20 = smov %s1071_s27 }
 0x249   : > { %s1212_s21 = smov %s1055_s14  ;;  %21 = sbr.rel (!%p19_p7) target bundleno = 6 (0x6), region = 93 }
 0x250   :  { %514 = vsyncpa [#allocation3], 1 }
 0x251   :  { %516 = vsyncpa [#allocation3 + $0x1], 1 }
 0x252   :  { %517 = vsyncpa [#allocation6], 1 }
 0x253   :  { %518 = vsyncpa [#allocation4], 1 }
 0x254   :  { %520 = vsyncpa [#allocation4 + $0x1], 1 }

// kernel: tpu_custom_call.1
= control target key start
LH: loop header
LB: loop body
LE: loop exit
PB: predicated region body
PF: predicated region fallthrough
CT: control target
= control target key end

     0   :  { %10 = vsyncpa [#allocation3], 0  ;;  %s1188_s0 = inlined_call_operand.hbm [shape: f32[48,64], index: 0, kind: input, shape index: {}]   ;;  %s1189_s1 = inlined_call_operand.hbm [shape: bf16[64,128], index: 1, kind: input, shape index: {}]   ;;  %s1190_s2 = inlined_call_operand.vmem [shape: f32[1,128], index: 2, kind: input, shape index: {}]   ;;  %s1191_s3 = inlined_call_operand.hbm [shape: bf16[128,128], index: 3, kind: input, shape index: {}]   ;;  %s1192_s4 = inlined_call_operand.vmem [shape: f32[1,128], index: 4, kind: input, shape index: {}]   ;;  %s1193_s5 = inlined_call_operand.hbm [shape: f32[48,128], index: 5, kind: output, shape index: {}]  }
   0x1   :  { %12 = vsyncpa [#allocation3 + $0x1], 0 }
   0x2   :  { %13 = vsyncpa [#allocation6], 0 }
   0x3   :  { %14 = vsyncpa [#allocation4], 0 }
   0x4   :  { %16 = vsyncpa [#allocation4 + $0x1], 0  ;;  %s953_s18 = smov 0   ;;  %s955_s19 = smov 0  }
   0x5   :  { %s957_s20 = smov 0   ;;  %s959_s21 = smov 0  }
   0x6 LB: > { %s974_s22 = sadd.s32 4294967295, %s909_s21   ;;  %s585_s23 = sadd.s32 4294967294, %s909_s21   ;;  %s909_s21 = sphi %s959_s21, %s1212_s21   ;;  %s905_s20 = sphi %s957_s20, %s1211_s20   ;;  %s901_s19 = sphi %s955_s19, %s1210_s19   ;;  %s897_s18 = sphi %s953_s18, %s1209_s18  }
   0x7   : > { %p42_p0 = scmp.ne.s32.totalorder %s901_s19, %s897_s18  ;;  %p1194_p1 = scmp.eq.s32.totalorder %s974_s22, 0 }
   0x8   : > { %p156_p3 = scmp.eq.s32.totalorder %s585_s23, 2  ;;  %p586_p5 = scmp.ge.s32.totalorder %s909_s21, 1 }
   0x9   : > { %p983_p4 = por %p1194_p1, %p42_p0  ;;  %p163_p7 = scmp.lt.s32.totalorder %s909_s21, 4 }
   0xa   : > { %p988_p6 = por %p156_p3, %p42_p0  ;;  %s911_s27 = smov [#allocation5]  }
   0xb   : > { %s1197_s24 = scalar_select %p983_p4, 1, 0 }
   0xc   : > { %s1198_s25 = scalar_select %p988_p6, 1, 0 }
   0xd   : > { %p993_p8 = pnand %p586_p5, %p163_p7  ;;  %s175_s28 = sshll.u32 %s911_s27, 4  ;;  %s176_s28 = int_to_ptr.vmem [resolvable:$true] %s175_s28 }
   0xe   : > { %s912_s30 = smov [#allocation7]   ;;  %s753_s9 = scalar_lea.hbm %s1189_s1, 512 }
   0xf   : > { %s1199_s26 = scalar_select %p993_p8, 1, 0 }
  0x10   : > { %p678_p9 = pneg %p993_p8  ;;  %s191_s6 = sshll.u32 %s912_s30, 4  ;;  %s1005_s6 = int_to_ptr.vmem [resolvable:$true] %s191_s6 }
  0x11   : > { %p754_p11 = scmp.ne.s32.totalorder %s1189_s1, %s753_s9  ;;  %p760_p3 = scmp.lt.u32.totalorder %s753_s9, %s1189_s1 }
  0x12   : > { %p1001_p10 = pnand %p678_p9, %p1194_p1 }
  0x14   : > { %p755_p12 = pneg %p1001_p10 }
  0x16   : > { %p756_p13 = pnand %p755_p12, %p754_p11 }
  0x18   : > { %p757_p0 = pneg %p756_p13 }
  0x1a   : > { %p762_p5 = pnand %p760_p3, %p757_p0 }
  0x1c   : > { %765 = shalt.err (!%p762_p5)
}
  0x1d   : > { %s766_s14 = scalar_lea.vmem %s176_s28, 512  ;;  %p774_p2 = scmp.lt.s32.totalorder %s176_s28, %s176_s28 }
  0x1e   : > { %p767_p7 = scmp.ne.s32.totalorder %s176_s28, %s766_s14  ;;  %p775_p6 = scmp.lt.s32.totalorder %s766_s14, %s766_s14 }
  0x20   : > { %p769_p9 = pnand %p767_p7, %p755_p12  ;;  %p776_p4 = por %p775_p6, %p774_p2 }
  0x22   : > { %p770_p1 = pneg %p769_p9 }
  0x24   : > { %p777_p8 = pnand %p776_p4, %p770_p1 }
  0x26   : > { %780 = shalt.err (!%p777_p8)
}
  0x27   : > { %s913_s15 = smov 64   ;;  %s914_s16 = smov 4  }
  0x28   : > { %681 = dma.hbm_to_vmem [thread:$0]  (!%p1001_p10), %s1189_s1, 512, %s176_s28, [#allocation6], %s913_s15, %s913_s15, %s914_s16  }
  0x29   : > { %s781_s7 = scalar_lea.hbm %s1191_s3, 1024 }
  0x2a   : > { %p782_p11 = scmp.ne.s32.totalorder %s1191_s3, %s781_s7  ;;  %p788_p4 = scmp.lt.u32.totalorder %s781_s7, %s1191_s3 }
  0x2c   : > { %p784_p1 = pnand %p782_p11, %p755_p12 }
  0x2e   : > { %p785_p2 = pneg %p784_p1 }
  0x30   : > { %p790_p6 = pnand %p788_p4, %p785_p2 }
  0x32   : > { %793 = shalt.err (!%p790_p6)
}
  0x33   : > { %s794_s28 = scalar_lea.vmem %s1005_s6, 1024  ;;  %p802_p3 = scmp.lt.s32.totalorder %s1005_s6, %s1005_s6 }
  0x34   : > { %p795_p8 = scmp.ne.s32.totalorder %s1005_s6, %s794_s28  ;;  %p803_p5 = scmp.lt.s32.totalorder %s794_s28, %s794_s28 }
  0x36   : > { %p797_p13 = pnand %p795_p8, %p755_p12  ;;  %p804_p7 = por %p803_p5, %p802_p3 }
  0x38   : > { %p798_p0 = pneg %p797_p13 }
  0x3a   : > { %p805_p9 = pnand %p804_p7, %p798_p0 }
  0x3c   : > { %808 = shalt.err (!%p805_p9)
}
  0x3d   : > { %684 = dma.hbm_to_vmem [thread:$0]  (!%p1001_p10), %s1191_s3, 1024, %s1005_s6, [#allocation6], %s913_s15, %s913_s15, %s914_s16  }
  0x3e   : > { %s1055_s14 = sadd.s32 1, %s909_s21   ;;  %s29_s29 = sadd.s32 1, %s905_s20 }
  0x3f   : > { %s26_s17 = ssub.s32 %s909_s21, %s1055_s14  ;;  %p36_p12 = scmp.ne.s32.totalorder %s905_s20, %s901_s19 }
  0x40   : > { %p27_p11 = scmp.eq.s32.totalorder %s26_s17, 0  ;;  %p37_p1 = scmp.eq.s32.totalorder %s909_s21, 0 }
  0x41   : > { %p1201_p2 = scmp.eq.s32.totalorder %s974_s22, 2  ;;  %p695_p6 = scmp.lt.s32.totalorder %s909_s21, 3 }
  0x42   : > { %s1071_s27 = scalar_select %p27_p11, %s905_s20, %s29_s29  }
  0x43   : > { %p1065_p4 = por %p1201_p2, %p36_p12  ;;  %p38_p8 = por %p37_p1, %p36_p12 }
  0x44   : > { %s208_s30 = sand.u32 1, %s905_s20   ;;  %s618_s6 = sshll.u32 %s909_s21, 8 }
  0x45   : > { %s590_s7 = sshll.u32 %s208_s30, 4  ;;  %s1078_s8 = scalar_lea.hbm %s1188_s0, %s618_s6 }
  0x46   : > { %s212_s9 = scalar_lea.vmem [#allocation2], %s590_s7  ;;  %p1082_p10 = pnand %p695_p6, %p38_p8 }
  0x47   : > { %s219_s10 = sshll.u32 %s212_s9, 4  ;;  %s1086_s28 = scalar_lea.sflag [#allocation3], %s208_s30  ;;  %s1080_s10 = int_to_ptr.vmem [resolvable:$true] %s219_s10 }
  0x48   : > { %s809_s12 = scalar_lea.hbm %s1078_s8, 256  ;;  %p811_p0 = pneg %p1082_p10 }
  0x49   : > { %p810_p13 = scmp.ne.s32.totalorder %s1078_s8, %s809_s12  ;;  %s814_s17 = scalar_lea.hbm %s1188_s0, 768 }
  0x4a   : > { %p815_p7 = scmp.lt.u32.totalorder %s1078_s8, %s1188_s0  ;;  %p816_p9 = scmp.lt.u32.totalorder %s814_s17, %s809_s12 }
  0x4b   : > { %p812_p3 = pnand %p811_p0, %p810_p13  ;;  %p818_p11 = scmp.lt.u32.totalorder %s809_s12, %s1078_s8 }
  0x4c   : > { %p817_p12 = por %p816_p9, %p815_p7 }
  0x4d   : > { %p813_p5 = pneg %p812_p3 }
  0x4e   : > { %p819_p1 = por %p818_p11, %p817_p12 }
  0x50   : > { %p820_p2 = pnand %p819_p1, %p813_p5 }
  0x52   : > { %823 = shalt.err (!%p820_p2)
}
  0x53   : > { %s824_s30 = scalar_lea.vmem %s1080_s10, 256  ;;  %s915_s15 = smov [#allocation2]  }
  0x54   : > { %p825_p6 = scmp.ne.s32.totalorder %s1080_s10, %s824_s30  ;;  %s829_s16 = sshll.u32 %s915_s15, 4  ;;  %s830_s16 = int_to_ptr.vmem [resolvable:$false] %s829_s16 }
  0x55   : > { %s831_s9 = scalar_lea.vmem %s830_s16, 512  ;;  %p832_p3 = scmp.lt.s32.totalorder %s1080_s10, %s830_s16 }
  0x56   : > { %p827_p8 = pnand %p825_p6, %p811_p0  ;;  %p833_p7 = scmp.lt.s32.totalorder %s831_s9, %s824_s30 }
  0x58   : > { %p828_p13 = pneg %p827_p8  ;;  %p834_p9 = por %p833_p7, %p832_p3 }
  0x5a   : > { %p835_p12 = pnand %p834_p9, %p828_p13 }
  0x5c   : > { %838 = shalt.err (!%p835_p12)
}
  0x5d   : > { %s916_s12 = smov 128   ;;  %s917_s13 = smov 8  }
  0x5e   : > { %688 = dma.hbm_to_vmem [thread:$0]  (!%p1082_p10), %s1078_s8, 256, %s1080_s10, %s1086_s28, %s916_s12, %s916_s12, %s917_s13  }
  0x5f   : > { %p1204_p0 = scmp.ne.s32.totalorder %s1199_s26, 0 }
  0x60   : > { %s1117_s29 = sand.u32 (!%p1204_p0), 1, %s901_s19   ;;  %p1205_p5 = scmp.ne.s32.totalorder (!%p1204_p0), %s1197_s24, 0 }
  0x61   : > { %231 = sbr.rel (%p1204_p0) target bundleno = 577 (0x241), region = 40  ;;  %s594_s17 = sshll.u32 (!%p1204_p0), %s1117_s29, 4 }
  0x62   : > { %s234_s7 = scalar_lea.sflag (!%p1204_p0), [#allocation3], %s1117_s29  ;;  %s237_s6 = scalar_lea.vmem (!%p1204_p0), [#allocation2], %s594_s17 }
  0x68   : > { %884 = dma.done.wait (%p1205_p5), %s234_s7, 256  }
  0x69   : > { %886 = vsyncadd (%p1205_p5), %s234_s7, 4294967040  ;;  %p1206_p10 = scmp.eq.s32.totalorder %s974_s22, 0 }
  0x6b   : > { %888 = dma.done.wait (%p1206_p10), [#allocation6], 1536   ;;  %p1207_p11 = pmov %p1206_p10 }
  0x6c   : > { %v918_v0 = vmov 0.0   ;;  %vm919_vm0 = vmmov 0   ;;  %v741_v1 = vld [vmem:[#allocation5] sm:$0xff]   ;;  %v742_v2 = vld [vmem:[#allocation5 + $0x8] sm:$0xff]   ;;  %v743_v4 = vld [vmem:[#allocation5 + $0x10] sm:$0xff]   ;;  %vm317_vm1 = vcmask 523264  }
  0x6d   : > { %890 = vsyncadd (%p1207_p11), [#allocation6], 4294965760  ;;  %634 = vmatprep.subr.bf16.mxu0 %v918_v0  ;;  %642 = vmatprep.mubr.msk.bf16.mxu0 %vm919_vm0, %v918_v0  ;;  %v745_v3 = vld [vmem:[#allocation7] sm:$0xff]   ;;  %v746_v5 = vld [vmem:[#allocation7 + $0x8] sm:$0xff]   ;;  %s271_s11 = scalar_lea.vmem [#allocation8], %s594_s17  ;;  %s619_s30 = sshll.u32 %s974_s22, 8 }
  0x6e   : > { %646 = vmatprep.subr.bf16.mxu1 %v918_v0  ;;  %662 = vmatprep.mubr.msk.bf16.mxu1 %vm919_vm0, %v918_v0  ;;  %v744_v6 = vld [vmem:[#allocation5 + $0x18] sm:$0xff]   ;;  %v275_v7 = vld [vmem:[%s237_s6] sm:$0xff]  ;;  %v750_v13 = vld [vmem:[#allocation7 + $0x28] sm:$0xff]   ;;  %s493_s28 = sshll.u32 %s271_s11, 4  ;;  %s1145_s9 = scalar_lea.hbm %s1193_s5, %s619_s30  ;;  %s1140_s28 = int_to_ptr.vmem [resolvable:$true] %s493_s28 }
  0x6f   : > { %635 = vmatpush3.bf16.msra.mxu0 %v741_v1  ;;  %647 = vmatpush3.bf16.msra.mxu1 %v745_v3  ;;  %v276_v8 = vld [vmem:[%s237_s6 + $0x8] sm:$0xff]  ;;  %v747_v9 = vld [vmem:[#allocation7 + $0x10] sm:$0xff]   ;;  %v749_v12 = vld [vmem:[#allocation7 + $0x20] sm:$0xff]   ;;  %s480_s12 = scalar_lea.sflag [#allocation4], %s1117_s29  ;;  %s839_s22 = scalar_lea.vmem %s1140_s28, 256 }
  0x70   : > { %636 = vmatprep.subr.bf16.mxu0 %v918_v0  ;;  %648 = vmatprep.subr.bf16.mxu1 %v918_v0  ;;  %v277_v10 = vpack.c.bf16 %v276_v8, %v275_v7  ;;  %v748_v11 = vld [vmem:[#allocation7 + $0x18] sm:$0xff]   ;;  %v751_v14 = vld [vmem:[#allocation7 + $0x30] sm:$0xff]   ;;  %v598_v16 = vld [vmem:[%s1190_s2] ss:$0 sm:$0xff]  ;;  %p840_p1 = scmp.ne.s32.totalorder %s1140_s28, %s839_s22  ;;  %s920_s13 = smov [#allocation8]  }
  0x71   : > { %v752_v15 = vld [vmem:[#allocation7 + $0x38] sm:$0xff]   ;;  %v604_v26 = vld [vmem:[%s1192_s4] ss:$0 sm:$0xff]  ;;  %s843_s17 = sshll.u32 %s920_s13, 4  ;;  %s844_s17 = int_to_ptr.vmem [resolvable:$false] %s843_s17 }
  0x72   : > { %p841_p2 = pnand %p840_p1, %p1065_p4  ;;  %s845_s7 = scalar_lea.vmem %s844_s17, 512 }
  0x73   : > { %637 = vmatpush3.bf16.msra.mxu0 %v742_v2  ;;  %649 = vmatpush3.bf16.msra.mxu1 %v746_v5  ;;  %p846_p8 = scmp.lt.s32.totalorder %s1140_s28, %s844_s17  ;;  %p847_p13 = scmp.lt.s32.totalorder %s845_s7, %s839_s22 }
  0x74   : > { %638 = vmatprep.subr.bf16.mxu0 %v918_v0  ;;  %650 = vmatprep.subr.bf16.mxu1 %v918_v0  ;;  %p842_p6 = pneg %p841_p2 }
  0x75   : > { %p848_p3 = por %p847_p13, %p846_p8 }
  0x77   : > { %639 = vmatpush3.bf16.msra.mxu0 %v743_v4  ;;  %651 = vmatpush3.bf16.msra.mxu1 %v747_v9  ;;  %p849_p7 = pnand %p848_p3, %p842_p6 }
  0x78   : > { %640 = vmatprep.subr.bf16.mxu0 %v918_v0  ;;  %652 = vmatprep.subr.bf16.mxu1 %v918_v0 }
  0x7b   : > { %641 = vmatpush3.bf16.msra.mxu0 %v744_v6  ;;  %653 = vmatpush3.bf16.msra.mxu1 %v748_v11 }
  0x7c   : > { %654 = vmatprep.subr.bf16.mxu1 %v918_v0 }
  0x7e   : > { %643 = vmatmul.mubr.msk.bf16.vlgmr.msra.gmra.mrb[0].mxu0 %vm317_vm1, %v277_v10 }
  0x7f   : > { %655 = vmatpush3.bf16.msra.mxu1 %v749_v12 }
  0x80   : > { %656 = vmatprep.subr.bf16.mxu1 %v918_v0 }
  0x83   : > { %657 = vmatpush3.bf16.msra.mxu1 %v750_v13 }
  0x84   : > { %658 = vmatprep.subr.bf16.mxu1 %v918_v0 }
  0x87   : > { %659 = vmatpush3.bf16.msra.mxu1 %v751_v14 }
  0x88   : > { %660 = vmatprep.subr.bf16.mxu1 %v918_v0 }
  0x8b   : > { %661 = vmatpush3.bf16.msra.mxu1 %v752_v15 }
 0x151   : > { %v355_v17 = vpop.f32.mrb[0].mxu0 }
 0x152   : > { %v356_v18 = vadd.f32 %v598_v16, %v355_v17  ;;  %v644_v19 = vpop.f32.mrb[1].mxu0 }
 0x153   : > { %v358_v20 = vpop.f32.mrb[2].mxu0 }
 0x154   : > { %v359_v21 = vadd.f32 %v598_v16, %v358_v20  ;;  %v645_v22 = vpop.f32.mrb[3].mxu0  ;;  %v362_v23 = vmax.f32 %v356_v18, 0.0 }
 0x156   : > { %v363_v24 = vmax.f32 %v359_v21, 0.0 }
 0x158   : > { %v364_v25 = vpack.c.bf16 %v363_v24, %v362_v23 }
 0x15a   : > { %663 = vmatmul.mubr.bf16.vlgmr.msra.gmra.mrb[0].mxu1 %v364_v25 }
 0x22d   : > { %v470_v27 = vpop.f32.mrb[0].mxu1 }
 0x22e   : > { %v471_v28 = vadd.f32 %v604_v26, %v470_v27  ;;  %v664_v29 = vpop.f32.mrb[1].mxu1 }
 0x22f   : > { %v473_v30 = vpop.f32.mrb[2].mxu1 }
 0x230   : > { %477 = vst [vmem:[%s271_s11] sm:$0xff] %v471_v28  ;;  %v474_v31 = vadd.f32 %v604_v26, %v473_v30  ;;  %v665_v32 = vpop.f32.mrb[3].mxu1 }
 0x232   : > { %478 = vst [vmem:[%s271_s11 + $0x8] sm:$0xff] %v474_v31 }
 0x233   : > { %852 = shalt.err (!%p849_p7)
}
 0x234   : > { %s853_s6 = scalar_lea.hbm %s1145_s9, 256  ;;  %s857_s8 = scalar_lea.hbm %s1193_s5, 768 }
 0x235   : > { %p854_p9 = scmp.ne.s32.totalorder %s1145_s9, %s853_s6  ;;  %p858_p5 = scmp.lt.u32.totalorder %s1145_s9, %s1193_s5 }
 0x236   : > { %p859_p10 = scmp.lt.u32.totalorder %s857_s8, %s853_s6  ;;  %p861_p1 = scmp.lt.u32.totalorder %s853_s6, %s1145_s9 }
 0x237   : > { %p855_p12 = pnand %p854_p9, %p1065_p4 }
 0x238   : > { %p860_p11 = por %p859_p10, %p858_p5 }
 0x239   : > { %p856_p0 = pneg %p855_p12 }
 0x23a   : > { %p862_p2 = por %p861_p1, %p860_p11 }
 0x23c   : > { %p863_p6 = pnand %p862_p2, %p856_p0 }
 0x23e   : > { %866 = shalt.err (!%p863_p6)
}
 0x23f   : > { %s921_s30 = smov 128   ;;  %s922_s15 = smov 8  }
 0x240   : > { %676 = dma.vmem_to_hbm [thread:$0]  (%p1065_p4), %s1140_s28, 256, %s1145_s9, %s480_s12, %s921_s30, %s921_s30, %s922_s15  }
 0x241 PF: > { %p698_p8 = scmp.ge.s32.totalorder %s909_s21, 2  ;;  %s508_s16 = sand.u32 1, %s897_s18  }
 0x242   : > { %p1208_p13 = scmp.ne.s32.totalorder %s1198_s25, 0  ;;  %s509_s22 = scalar_lea.sflag [#allocation4], %s508_s16 }
 0x244   : > { %p690_p3 = pnand %p698_p8, %p1208_p13 }
 0x246   : > { %892 = dma.done.wait (!%p690_p3), %s509_s22, 256  }
 0x247   : > { %894 = vsyncadd (!%p690_p3), %s509_s22, 4294967040  ;;  %p19_p7 = scmp.ge.s32.totalorder %s1055_s14, 5   ;;  %s1209_s18 = smov %s901_s19 }
 0x248   : > { %s1210_s19 = smov %s905_s20  ;;  %s1211_s20 = smov %s1071_s27 }
 0x249   : > { %s1212_s21 = smov %s1055_s14  ;;  %21 = sbr.rel (!%p19_p7) target bundleno = 6 (0x6), region = 93 }
 0x250   :  { %514 = vsyncpa [#allocation3], 1 }
 0x251   :  { %516 = vsyncpa [#allocation3 + $0x1], 1 }
 0x252   :  { %517 = vsyncpa [#allocation6], 1 }
 0x253   :  { %518 = vsyncpa [#allocation4], 1 }
 0x254   :  { %520 = vsyncpa [#allocation4 + $0x1], 1 }

</bundles_post_ra>
